<compile_context>
chip_gen: v7x
topology: tpu7x:2x2x1
jax: 0.10.0
libtpu: 0.0.40
codegen_flags: <defaults>
</compile_context>

<pallas_src>
import jax
import jax.numpy as jnp
from jax.experimental import pallas as pl
from jax.experimental.pallas import tpu as pltpu


def _round_up(a: int, b: int) -> int:
    return ((a + b - 1) // b) * b


def _mlp_kernel(x_ref, w1_ref, b1_ref, w2_ref, b2_ref, w3_ref, b3_ref, o_ref):
    # x_ref:  [2, TN]   (features on sublanes, batch on lanes)
    # w1_ref: [10, 2]   b1_ref: [10, 1]
    # w2_ref: [10, 10]  b2_ref: [10, 1]
    # w3_ref: [10, 1]   b3_ref: [1, 1]
    # o_ref:  [1, TN]
    x0 = x_ref[0:1, :]                                   # [1, TN]
    x1 = x_ref[1:2, :]                                   # [1, TN]

    w1 = w1_ref[...]                                     # [10, 2]
    # Layer 1 (in=2): two VPU broadcast multiply-adds, no MXU.
    h1 = w1[:, 0:1] * x0 + w1[:, 1:2] * x1 + b1_ref[...]  # [10, TN]
    h1 = jnp.maximum(h1, 0.0)

    # Layer 2 (10x10): lane-dense along TN, keep on the MXU.
    h2 = jnp.dot(w2_ref[...], h1, preferred_element_type=jnp.float32) + b2_ref[...]
    h2 = jnp.maximum(h2, 0.0)                            # [10, TN]

    # Layer 3 (out=1): VPU multiply + sublane reduce, no MXU.
    out = jnp.sum(w3_ref[...] * h2, axis=0, keepdims=True) + b3_ref[...]  # [1, TN]
    o_ref[...] = out.astype(o_ref.dtype)


def circle_model_v2(x, params, *, tn_max=2048):
    """Fused forward pass. x: [N, 2] float32 -> [N, 1] float32."""
    w1, b1, w2, b2, w3, b3 = params
    n = x.shape[0]

    # Lane tile: multiple of 128, capped so tiny batches don't over-pad.
    tn = min(tn_max, _round_up(n, 128))
    n_pad = _round_up(n, tn)
    grid = (n_pad // tn,)

    # Feature-major layout, zero-pad the batch (lane) axis to a tile multiple.
    xt = jnp.pad(x.T, ((0, 0), (0, n_pad - n)))          # [2, n_pad]

    out_t = pl.pallas_call(
        _mlp_kernel,
        out_shape=jax.ShapeDtypeStruct((1, n_pad), jnp.float32),
        grid=grid,
        in_specs=[
            pl.BlockSpec((2, tn), lambda i: (0, i)),      # x tile, pipelined
            pl.BlockSpec((10, 2), lambda i: (0, 0)),      # weights/biases stay
            pl.BlockSpec((10, 1), lambda i: (0, 0)),      # resident (constant
            pl.BlockSpec((10, 10), lambda i: (0, 0)),     # block index => no
            pl.BlockSpec((10, 1), lambda i: (0, 0)),      # re-DMA per step)
            pl.BlockSpec((10, 1), lambda i: (0, 0)),
            pl.BlockSpec((1, 1), lambda i: (0, 0)),
        ],
        out_specs=pl.BlockSpec((1, tn), lambda i: (0, i)),
        compiler_params=pltpu.CompilerParams(
            dimension_semantics=("parallel",),            # shard batch across TCs (v7x)
            vmem_limit_bytes=32 * 1024 * 1024,            # safe on v5e/v6e/v7x
        ),
    )(
        xt,
        w1,                   # [10, 2]  (PyTorch [out, in] layout used as-is)
        b1.reshape(10, 1),
        w2,                   # [10, 10]
        b2.reshape(10, 1),
        w3.T,                 # [10, 1]
        b3.reshape(1, 1),
    )

    return out_t[:, :n].T     # back to [N, 1]


def init_params(key):
    """Deterministic init mirroring nn.Linear shapes (weight: [out, in])."""
    ks = jax.random.split(key, 6)

    def uniform_like_torch(k, shape, fan_in):
        bound = 1.0 / jnp.sqrt(fan_in)
        return jax.random.uniform(k, shape, jnp.float32, -bound, bound)

    w1 = uniform_like_torch(ks[0], (10, 2), 2.0)
    b1 = uniform_like_torch(ks[1], (10,), 2.0)
    w2 = uniform_like_torch(ks[2], (10, 10), 10.0)
    b2 = uniform_like_torch(ks[3], (10,), 10.0)
    w3 = uniform_like_torch(ks[4], (1, 10), 10.0)
    b3 = uniform_like_torch(ks[5], (1,), 10.0)
    return (w1, b1, w2, b2, w3, b3)


def reference_forward(x, params):
    """Plain-JAX reference with identical semantics to the PyTorch module."""
    w1, b1, w2, b2, w3, b3 = params
    h1 = jnp.maximum(x @ w1.T + b1, 0.0)
    h2 = jnp.maximum(h1 @ w2.T + b2, 0.0)
    return h2 @ w3.T + b3


if __name__ == "__main__":
    key = jax.random.PRNGKey(0)
    k_params, k_x1, k_x2 = jax.random.split(key, 3)

    params = init_params(k_params)

    # Small case (batch=8, features=2) — single grid step, padded to one tile.
    x_small = jax.random.normal(k_x1, (8, 2), jnp.float32)
    out_small = jax.block_until_ready(circle_model_v2(x_small, params))
    ref_small = reference_forward(x_small, params)
    assert out_small.shape == (8, 1)
    assert jnp.allclose(out_small, ref_small, atol=1e-5, rtol=1e-5)

    # Multi-tile case with a ragged tail — exercises the batch grid + padding.
    x_big = jax.random.normal(k_x2, (300, 2), jnp.float32)
    out_big = jax.block_until_ready(circle_model_v2(x_big, params, tn_max=128))
    ref_big = reference_forward(x_big, params)
    assert out_big.shape == (300, 1)
    assert jnp.allclose(out_big, ref_big, atol=1e-5, rtol=1e-5)

    print("KERNEL_OK")
</pallas_src>

<mosaic_0001>
module attributes {stable_mosaic.version = 11 : i64} {
  func.func @_mlp_kernel(%arg0: i32, %arg1: memref<2x128xf32, #tpu.memory_space<vmem>>, %arg2: memref<10x2xf32, #tpu.memory_space<vmem>>, %arg3: memref<10x1xf32, #tpu.memory_space<vmem>>, %arg4: memref<10x10xf32, #tpu.memory_space<vmem>>, %arg5: memref<10x1xf32, #tpu.memory_space<vmem>>, %arg6: memref<10x1xf32, #tpu.memory_space<vmem>>, %arg7: memref<1x1xf32, #tpu.memory_space<vmem>>, %arg8: memref<1x128xf32, #tpu.memory_space<vmem>>) attributes {dimension_semantics = [#tpu.dimension_semantics<parallel>], iteration_bounds = array<i64: 1>, scalar_prefetch = 0 : i64, scratch_operands = 0 : i64, tpu.core_type = #tpu.core_type<tc>, window_params = [{transform_indices = @transform_0, window_bounds = array<i64: 2, 128>}, {pipeline_mode = #tpu.pipeline_mode<synchronous>, transform_indices = @transform_1, window_bounds = array<i64: 10, 2>}, {pipeline_mode = #tpu.pipeline_mode<synchronous>, transform_indices = @transform_2, window_bounds = array<i64: 10, 1>}, {pipeline_mode = #tpu.pipeline_mode<synchronous>, transform_indices = @transform_3, window_bounds = array<i64: 10, 10>}, {pipeline_mode = #tpu.pipeline_mode<synchronous>, transform_indices = @transform_4, window_bounds = array<i64: 10, 1>}, {pipeline_mode = #tpu.pipeline_mode<synchronous>, transform_indices = @transform_5, window_bounds = array<i64: 10, 1>}, {pipeline_mode = #tpu.pipeline_mode<synchronous>, transform_indices = @transform_6, window_bounds = array<i64: 1, 1>}, {transform_indices = @transform_7, window_bounds = array<i64: 1, 128>}]} {
    %c0 = arith.constant 0 : index
    %c0_0 = arith.constant 0 : index
    %0 = vector.load %arg1[%c0, %c0_0] : memref<2x128xf32, #tpu.memory_space<vmem>>, vector<1x128xf32>
    %c1 = arith.constant 1 : index
    %c0_1 = arith.constant 0 : index
    %1 = vector.load %arg1[%c1, %c0_1] : memref<2x128xf32, #tpu.memory_space<vmem>>, vector<1x128xf32>
    %c0_2 = arith.constant 0 : index
    %c0_3 = arith.constant 0 : index
    %2 = vector.load %arg2[%c0_2, %c0_3] : memref<10x2xf32, #tpu.memory_space<vmem>>, vector<10x2xf32>
    %3 = vector.extract_strided_slice %2 {offsets = [0, 0], sizes = [10, 1], strides = [1, 1]} : vector<10x2xf32> to vector<10x1xf32>
    %4 = vector.broadcast %3 : vector<10x1xf32> to vector<10x128xf32>
    %5 = vector.broadcast %0 : vector<1x128xf32> to vector<10x128xf32>
    %6 = arith.mulf %4, %5 : vector<10x128xf32>
    %7 = vector.extract_strided_slice %2 {offsets = [0, 1], sizes = [10, 1], strides = [1, 1]} : vector<10x2xf32> to vector<10x1xf32>
    %8 = vector.broadcast %7 : vector<10x1xf32> to vector<10x128xf32>
    %9 = vector.broadcast %1 : vector<1x128xf32> to vector<10x128xf32>
    %10 = arith.mulf %8, %9 : vector<10x128xf32>
    %11 = arith.addf %6, %10 : vector<10x128xf32>
    %c0_4 = arith.constant 0 : index
    %c0_5 = arith.constant 0 : index
    %12 = vector.load %arg3[%c0_4, %c0_5] : memref<10x1xf32, #tpu.memory_space<vmem>>, vector<10x1xf32>
    %13 = vector.broadcast %12 : vector<10x1xf32> to vector<10x128xf32>
    %14 = arith.addf %11, %13 : vector<10x128xf32>
    %cst = arith.constant 0.000000e+00 : f32
    %15 = vector.broadcast %cst : f32 to vector<10x128xf32>
    %16 = arith.maximumf %14, %15 : vector<10x128xf32>
    %c0_6 = arith.constant 0 : index
    %c0_7 = arith.constant 0 : index
    %17 = vector.load %arg4[%c0_6, %c0_7] : memref<10x10xf32, #tpu.memory_space<vmem>>, vector<10x10xf32>
    %cst_8 = arith.constant dense<0.000000e+00> : vector<10x128xf32>
    %18 = tpu.matmul %17, %16, %cst_8 {dimension_numbers = #tpu.dot_dimension_numbers<[1], [0], [0], [1], [0, 0, 1, 1], [], []>} : vector<10x10xf32>, vector<10x128xf32>, vector<10x128xf32> -> vector<10x128xf32>
    %c0_9 = arith.constant 0 : index
    %c0_10 = arith.constant 0 : index
    %19 = vector.load %arg5[%c0_9, %c0_10] : memref<10x1xf32, #tpu.memory_space<vmem>>, vector<10x1xf32>
    %20 = vector.broadcast %19 : vector<10x1xf32> to vector<10x128xf32>
    %21 = arith.addf %18, %20 : vector<10x128xf32>
    %cst_11 = arith.constant 0.000000e+00 : f32
    %22 = vector.broadcast %cst_11 : f32 to vector<10x128xf32>
    %23 = arith.maximumf %21, %22 : vector<10x128xf32>
    %c0_12 = arith.constant 0 : index
    %c0_13 = arith.constant 0 : index
    %24 = vector.load %arg6[%c0_12, %c0_13] : memref<10x1xf32, #tpu.memory_space<vmem>>, vector<10x1xf32>
    %25 = vector.broadcast %24 : vector<10x1xf32> to vector<10x128xf32>
    %26 = arith.mulf %25, %23 : vector<10x128xf32>
    %cst_14 = arith.constant dense<0.000000e+00> : vector<128xf32>
    %27 = vector.multi_reduction <add>, %26, %cst_14 [0] : vector<10x128xf32> to vector<128xf32>
    %28 = vector.shape_cast %27 : vector<128xf32> to vector<1x128xf32>
    %c0_15 = arith.constant 0 : index
    %c0_16 = arith.constant 0 : index
    %29 = vector.load %arg7[%c0_15, %c0_16] : memref<1x1xf32, #tpu.memory_space<vmem>>, vector<1x1xf32>
    %30 = vector.broadcast %29 : vector<1x1xf32> to vector<1x128xf32>
    %31 = arith.addf %28, %30 : vector<1x128xf32>
    %c0_17 = arith.constant 0 : index
    %c0_18 = arith.constant 0 : index
    %32 = vector.load %arg8[%c0_17, %c0_18] : memref<1x128xf32, #tpu.memory_space<vmem>>, vector<1x128xf32>
    tpu.vector_store %arg8[%c0_17, %c0_18], %31 {strides = array<i32>} : memref<1x128xf32, #tpu.memory_space<vmem>>, vector<1x128xf32>,
    return
  }
  func.func @transform_0(%arg0: i32) -> (i32, i32) {
    %c0_i32 = arith.constant 0 : i32
    %c0_i32_0 = arith.constant 0 : i32
    return %c0_i32, %arg0 : i32, i32
  }
  func.func @transform_1(%arg0: i32) -> (i32, i32) {
    %c0_i32 = arith.constant 0 : i32
    %c0_i32_0 = arith.constant 0 : i32
    %c0_i32_1 = arith.constant 0 : i32
    return %c0_i32, %c0_i32_0 : i32, i32
  }
  func.func @transform_2(%arg0: i32) -> (i32, i32) {
    %c0_i32 = arith.constant 0 : i32
    %c0_i32_0 = arith.constant 0 : i32
    %c0_i32_1 = arith.constant 0 : i32
    return %c0_i32, %c0_i32_0 : i32, i32
  }
  func.func @transform_3(%arg0: i32) -> (i32, i32) {
    %c0_i32 = arith.constant 0 : i32
    %c0_i32_0 = arith.constant 0 : i32
    %c0_i32_1 = arith.constant 0 : i32
    return %c0_i32, %c0_i32_0 : i32, i32
  }
  func.func @transform_4(%arg0: i32) -> (i32, i32) {
    %c0_i32 = arith.constant 0 : i32
    %c0_i32_0 = arith.constant 0 : i32
    %c0_i32_1 = arith.constant 0 : i32
    return %c0_i32, %c0_i32_0 : i32, i32
  }
  func.func @transform_5(%arg0: i32) -> (i32, i32) {
    %c0_i32 = arith.constant 0 : i32
    %c0_i32_0 = arith.constant 0 : i32
    %c0_i32_1 = arith.constant 0 : i32
    return %c0_i32, %c0_i32_0 : i32, i32
  }
  func.func @transform_6(%arg0: i32) -> (i32, i32) {
    %c0_i32 = arith.constant 0 : i32
    %c0_i32_0 = arith.constant 0 : i32
    %c0_i32_1 = arith.constant 0 : i32
    return %c0_i32, %c0_i32_0 : i32, i32
  }
  func.func @transform_7(%arg0: i32) -> (i32, i32) {
    %c0_i32 = arith.constant 0 : i32
    %c0_i32_0 = arith.constant 0 : i32
    return %c0_i32, %arg0 : i32, i32
  }
}

</mosaic_0001>

<bundles_post_ra>
// kernel: tpu_custom_call.1
= control target key start
LH: loop header
LB: loop body
LE: loop exit
PB: predicated region body
PF: predicated region fallthrough
CT: control target
= control target key end

     0   :  { %s383_s0 = inlined_call_operand.vmem [shape: f32[2,128], index: 0, kind: input, shape index: {}]   ;;  %s384_s1 = inlined_call_operand.vmem [shape: f32[10,2], index: 1, kind: input, shape index: {}]   ;;  %s385_s2 = inlined_call_operand.vmem [shape: f32[10,1], index: 2, kind: input, shape index: {}]   ;;  %s386_s3 = inlined_call_operand.vmem [shape: f32[10,10], index: 3, kind: input, shape index: {}]   ;;  %s387_s4 = inlined_call_operand.vmem [shape: f32[10,1], index: 4, kind: input, shape index: {}]   ;;  %s388_s5 = inlined_call_operand.vmem [shape: f32[10,1], index: 5, kind: input, shape index: {}]   ;;  %s389_s6 = inlined_call_operand.<no memory space> [shape: f32[1,1], index: 6, kind: input, shape index: {}]   ;;  %s390_s7 = inlined_call_operand.hbm [shape: f32[1,128], index: 7, kind: output, shape index: {}]  }
   0x1   :  { %v12_v0 = vstv %s389_s6 }
   0x2   :  { %13 = vst [vmem:[#allocation2] sm:$0x1] %v12_v0 }
   0x3   :  { %v31_v1 = vld [vmem:[%s384_s1] sm:$0xff]  ;;  %v284_v2 = vmov 1   ;;  %v285_v3 = vmov 0   ;;  %v32_v4 = vld [vmem:[%s384_s1 + $0x8] sm:$0x3] }
   0x4   :  { %258 = vset.pattern.permute.xlu1 %v284_v2  ;;  %257 = vset.pattern.permute.xlu0 %v285_v3 }
   0x5   :  { %50 = vperm.xlu1 %258, %v31_v1   ;;  %35 = vperm.xlu0 %257, %v31_v1  }
   0x6   :  { %14 = vsyncpa [#allocation4], 0  ;;  %v65_v5 = vld [vmem:[%s385_s2] sm:$0xff]  ;;  %v66_v6 = vld [vmem:[%s385_s2 + $0x8] sm:$0x3]  ;;  %vm95_vm0 = vcmask 80896   ;;  %v211_v46 = vlaneseq }
   0x7   :  { %v84_v7 = vld [vmem:[%s387_s4 + $0x8] sm:$0x3]  ;;  %v83_v8 = vld [vmem:[%s387_s4] sm:$0xff]  ;;  %vm102_vm1 = vcmask 1041408   ;;  %vm286_vm2 = vmmov 1  }
   0x8   :  { %v184_v9 = vld [vmem:[%s388_s5 + $0x8] sm:$0x3]  ;;  %v183_v10 = vld [vmem:[%s388_s5] sm:$0xff]  ;;  %vm248_vm3 = vmpackc.low %vm102_vm1, %vm286_vm2  ;;  %v212_v49 = vshrl.u32 %v211_v46, 7 }
   0x9   :  { %54 = vperm.xlu1 %258, %v32_v4   ;;  %40 = vperm.xlu0 %257, %v32_v4   ;;  %v81_v11 = vld [vmem:[%s386_s3] sm:$0xff]  ;;  %v82_v32 = vld [vmem:[%s386_s3 + $0x8] sm:$0x3]  ;;  %s287_s3 = smov [#allocation3]  }
   0xa   :  { %v205_v12 = vld [vmem:[#allocation2] sm:$0x1]  ;;  %244 = vmatprep.mubr.msk.f32.mxu0 %vm95_vm0, %v81_v11  ;;  %v232_v14 = vld [vmem:[%s383_s0 + $0x1] ss:$0 sm:$0xff]  ;;  %v213_v52 = vsub.s32 0, %v212_v49  ;;  %s223_s21 = sshll.u32 %s287_s3, 4  ;;  %s224_s21 = int_to_ptr.vmem [resolvable:$true] %s223_s21 }
   0xb   :  { %v231_v16 = vld [vmem:[%s383_s0] ss:$0 sm:$0xff]  ;;  %s260_s22 = scalar_lea.vmem %s224_s21, 16  ;;  %s264_s23 = scalar_lea.vmem %s224_s21, 32 }
   0xc   :  { %p261_p0 = scmp.ne.s32.totalorder %s224_s21, %s260_s22  ;;  %p265_p1 = scmp.lt.s32.totalorder %s224_s21, %s224_s21 }
   0xd   :  { %259 = vset.pattern.permute.xlu1 %v285_v3  ;;  %69 = vperm.xlu0 %257, %v65_v5   ;;  %p266_p2 = scmp.lt.s32.totalorder %s264_s23, %s260_s22 }
   0xe   :  { %74 = vperm.xlu1 %259, %v66_v6  }
   0xf   :  { %p267_p3 = por %p266_p2, %p265_p1 }
  0x11   :  { %92 = vperm.xlu0 %257, %v84_v7   ;;  %p268_p4 = pnand %p267_p3, %p261_p0 }
  0x12   :  { %87 = vperm.xlu1 %259, %v83_v8  }
  0x15   :  { %192 = vperm.xlu0 %257, %v184_v9  }
  0x16   :  { %187 = vperm.xlu1 %259, %v183_v10  }
  0x19   :  { %208 = vperm.xlu0 %257, %v205_v12  }
  0x84   :  { %v51_v13 = vpop.permute.xlu1 %50  ;;  %v36_v15 = vpop.permute.xlu0 %35 }
  0x85   :  { %v61_v17 = vmul.f32 %v232_v14, %v51_v13  ;;  %v47_v18 = vmul.f32 %v231_v16, %v36_v15 }
  0x87   :  { %v63_v23 = vadd.f32 %v61_v17, %v47_v18 }
  0x88   :  { %v55_v19 = vpop.permute.xlu1 %54  ;;  %v41_v20 = vpop.permute.xlu0 %40 }
  0x89   :  { %v62_v21 = vmul.f32 %v232_v14, %v55_v19  ;;  %v48_v22 = vmul.f32 %v231_v16, %v41_v20 }
  0x8b   :  { %v64_v24 = vadd.f32 %v62_v21, %v48_v22 }
  0x8c   :  { %v70_v25 = vpop.permute.xlu0 %69 }
  0x8d   :  { %v77_v26 = vadd.f32 %v70_v25, %v63_v23  ;;  %v75_v27 = vpop.permute.xlu1 %74 }
  0x8e   :  { %v78_v28 = vadd.f32 %v75_v27, %v64_v24 }
  0x8f   :  { %v79_v29 = vmax.f32 %v77_v26, 0.0 }
  0x90   :  { %v80_v30 = vmax.f32 %v78_v28, 0.0  ;;  %v93_v33 = vpop.permute.xlu0 %92 }
  0x91   :  { %v88_v34 = vpop.permute.xlu1 %87 }
  0x92   :  { %v247_v31 = vpack.c.bf16 %v80_v30, %v79_v29 }
  0x94   :  { %249 = vmatprep.subr.msk.bf16.mxu0 %vm248_vm3, %v247_v31  ;;  %v193_v40 = vpop.permute.xlu0 %192 }
  0x95   :  { %252 = vmatpush3.bf16.msk.msra.mxu0 %vm248_vm3, %v247_v31  ;;  %v188_v42 = vpop.permute.xlu1 %187 }
  0x98   :  { %245 = vmatmul.mubr.msk.f32.vlgmr.msra.gmra.mrb[0].mxu0 %vm95_vm0, %v82_v32  ;;  %v209_v54 = vpop.permute.xlu0 %208 }
  0x99   :  { %v214_v56 = vrot.slane %v209_v54, %v213_v52 }
 0x16b   :  { %v246_v35 = vpop.f32.mrb[0].mxu0 }
 0x16c   :  { %v178_v36 = vadd.f32 %v246_v35, %v93_v33  ;;  %v172_v37 = vpop.f32.mrb[1].mxu0 }
 0x16d   :  { %v173_v38 = vadd.f32 %v172_v37, %v88_v34 }
 0x16e   :  { %v182_v39 = vmax.f32 %v178_v36, 0.0 }
 0x16f   :  { %v181_v41 = vmax.f32 %v173_v38, 0.0 }
 0x170   :  { %v196_v43 = vmul.f32 %v193_v40, %v182_v39 }
 0x171   :  { %v195_v44 = vmul.f32 %v188_v42, %v181_v41 }
 0x172   :  { %v197_v45 = vsel %vm102_vm1, %v196_v43, 0.0 }
 0x173   :  { %v198_v47 = vadd.f32 %v197_v45, %v195_v44 }
 0x175   :  { %v199_v48 = vrot.slane %v198_v47, 4 }
 0x177   :  { %v200_v50 = vadd.f32 %v199_v48, %v198_v47 }
 0x179   :  { %v201_v51 = vrot.slane %v200_v50, 2 }
 0x17b   :  { %v202_v53 = vadd.f32 %v201_v51, %v200_v50 }
 0x17d   :  { %v203_v55 = vrot.slane %v202_v53, 1 }
 0x17f   :  { %v204_v57 = vadd.f32 %v203_v55, %v202_v53 }
 0x181   :  { %v215_v58 = vadd.f32 %v214_v56, %v204_v57 }
 0x183   :  { %216 = vst [vmem:[#allocation3] sm:$0x1] %v215_v58 }
 0x184   :  { %271 = shalt.err (!%p268_p4)
}
 0x185   :  { %s272_s26 = scalar_lea.hbm %s390_s7, 16 }
 0x186   :  { %p273_p5 = scmp.ne.s32.totalorder %s390_s7, %s272_s26  ;;  %p276_p6 = scmp.lt.u32.totalorder %s272_s26, %s390_s7 }
 0x188   :  { %p278_p7 = pnand %p276_p6, %p273_p5 }
 0x18a   :  { %281 = shalt.err (!%p278_p7)
}
 0x18b   :  { %226 = dma.vmem_to_hbm [thread:$0]  %s224_s21, 16, %s390_s7, [#allocation4]  }
 0x18c   :  { %282 = dma.done.wait [#allocation4], 16  }
 0x18d   :  { %283 = vsyncadd [#allocation4], 4294967280 }
 0x18e   :  { %230 = vsyncpa [#allocation4], 1 }

</bundles_post_ra>
